<compile_context>
chip_gen: v7x
topology: tpu7x:2x2x1
jax: 0.10.0
libtpu: 0.0.40
codegen_flags: <defaults>
</compile_context>

<pallas_src>
import functools

import jax
import jax.numpy as jnp
from jax.experimental import pallas as pl
from jax.experimental.pallas import tpu as pltpu

_LANE = 128        # lane width of a vreg
_SUBLANE = 16      # keep batch tiles a multiple of 16 (safe for f32 and bf16 packing)


def _round_up(x, m):
    return (x + m - 1) // m * m


def _mlp_kernel(x_ref, w1_ref, b1_ref, w2_ref, b2_ref, o_ref):
    # Cast x to bf16 in-kernel (VPU cast overlaps with MXU work; no extra HBM pass).
    x_bf16 = x_ref[...].astype(jnp.bfloat16)
    # fc1 on the MXU: bf16 operands, f32 accumulation.
    h = jnp.dot(x_bf16, w1_ref[...], preferred_element_type=jnp.float32)
    # bias add + ReLU in f32 on the VPU (correct on v5e which has no bf16 VPU).
    h = jnp.maximum(h + b1_ref[...], 0.0)
    # fc2: deliberate bf16 downcast of the fc1 activation for the MXU; accumulate f32.
    out = jnp.dot(h.astype(jnp.bfloat16), w2_ref[...],
                  preferred_element_type=jnp.float32)
    # Output tile is lane-dense (last dim padded to a multiple of 128) -> unmasked vst.
    o_ref[...] = (out + b2_ref[...]).astype(o_ref.dtype)


def prepare_simple_nn_params(w1, b1, w2, b2):
    """One-time parameter prep, hoisted out of the per-call path.

    Casts weights to bf16, biases to f32, and pads fc2's output dim to a
    lane-dense multiple of 128 (zero columns contribute nothing and are
    stripped by the forward wrapper).
    """
    hidden, num_classes = w2.shape
    n_pad = _round_up(num_classes, _LANE)
    w1_b = jnp.asarray(w1, jnp.bfloat16)
    b1_f = jnp.asarray(b1, jnp.float32).reshape(1, -1)
    w2_p = jnp.zeros((hidden, n_pad), jnp.bfloat16).at[:, :num_classes].set(
        jnp.asarray(w2, jnp.bfloat16))
    b2_p = jnp.zeros((1, n_pad), jnp.float32).at[:, :num_classes].set(
        jnp.asarray(b2, jnp.float32).reshape(1, -1))
    return w1_b, b1_f, w2_p, b2_p, num_classes


@functools.partial(jax.jit, static_argnames=("num_classes", "block_b"))
def simple_nn_forward(x, w1_bf16, b1_f32, w2_pad_bf16, b2_pad_f32, *,
                      num_classes, block_b=256):
    """Pallas TPU forward pass of SimpleNN: fc2(relu(fc1(x)))."""
    B, in_features = x.shape
    hidden = w1_bf16.shape[1]
    n_pad = w2_pad_bf16.shape[1]
    out_dtype = x.dtype

    # Batch tiling: biggest tile up to block_b, multiple of 16 sublanes.
    blk = max(_SUBLANE, _round_up(min(block_b, B), _SUBLANE))
    # v7x has 2 TensorCores: make sure the parallel batch axis has >= 2 tiles
    # whenever the batch is big enough, so both cores get work.
    if B >= 2 * _SUBLANE:
        half = _round_up(pl.cdiv(B, 2), _SUBLANE)
        blk = min(blk, half)
    b_pad = _round_up(B, blk)
    grid_b = b_pad // blk

    # Pad the batch only when necessary (single-axis pad; x stays in native dtype).
    x_in = x if b_pad == B else jnp.pad(x, ((0, b_pad - B), (0, 0)))

    # Cost estimate reflects what the kernel actually touches once: x once in its
    # native dtype, resident bf16 weights once, f32 biases, f32 output.
    flops = 2 * b_pad * (in_features * hidden + hidden * n_pad)
    bytes_accessed = (b_pad * in_features * x.dtype.itemsize
                      + w1_bf16.size * 2 + w2_pad_bf16.size * 2
                      + b1_f32.size * 4 + b2_pad_f32.size * 4
                      + b_pad * n_pad * jnp.dtype(out_dtype).itemsize)

    out_padded = pl.pallas_call(
        _mlp_kernel,
        out_shape=jax.ShapeDtypeStruct((b_pad, n_pad), out_dtype),
        grid_spec=pltpu.PrefetchScalarGridSpec(
            num_scalar_prefetch=0,
            grid=(grid_b,),
            in_specs=[
                # batch-tiled activations; weights/biases resident in VMEM
                # (constant index_map). At these sizes whole-array weight blocks
                # fit comfortably even on v7x's 64 MiB VMEM; if the model scales
                # up, re-derive blk against that ceiling and set vmem_limit_bytes.
                pl.BlockSpec((blk, in_features), lambda i: (i, 0)),
                pl.BlockSpec((in_features, hidden), lambda i: (0, 0)),
                pl.BlockSpec((1, hidden), lambda i: (0, 0)),
                pl.BlockSpec((hidden, n_pad), lambda i: (0, 0)),
                pl.BlockSpec((1, n_pad), lambda i: (0, 0)),
            ],
            out_specs=pl.BlockSpec((blk, n_pad), lambda i: (i, 0)),
        ),
        compiler_params=pltpu.CompilerParams(
            dimension_semantics=("parallel",)),  # batch tiles shard across TCs (v7x)
        cost_estimate=pl.CostEstimate(
            flops=flops, transcendentals=0, bytes_accessed=bytes_accessed),
    )(x_in, w1_bf16, b1_f32, w2_pad_bf16, b2_pad_f32)

    # Strip padding only if any exists (avoids an extra copy in the aligned case).
    if b_pad == B and n_pad == num_classes:
        return out_padded
    return out_padded[:B, :num_classes]


def init_simple_nn_params(key, input_size, hidden_size, num_classes,
                          dtype=jnp.float32):
    """Deterministic init matching nn.Linear's U(-1/sqrt(fan_in), 1/sqrt(fan_in))."""
    k1, k2, k3, k4 = jax.random.split(key, 4)
    bound1 = 1.0 / (input_size ** 0.5)
    bound2 = 1.0 / (hidden_size ** 0.5)
    # stored as [in, out] (transpose of torch's [out, in]) so the kernel does x @ W
    w1 = jax.random.uniform(k1, (input_size, hidden_size), dtype,
                            minval=-bound1, maxval=bound1)
    b1 = jax.random.uniform(k2, (1, hidden_size), dtype,
                            minval=-bound1, maxval=bound1)
    w2 = jax.random.uniform(k3, (hidden_size, num_classes), dtype,
                            minval=-bound2, maxval=bound2)
    b2 = jax.random.uniform(k4, (1, num_classes), dtype,
                            minval=-bound2, maxval=bound2)
    return w1, b1, w2, b2


if __name__ == "__main__":
    input_size, hidden_size, num_classes = 32, 64, 16
    batch = 16

    key = jax.random.PRNGKey(0)
    kx, kp = jax.random.split(key)
    x = jax.random.normal(kx, (batch, input_size), jnp.float32)
    w1, b1, w2, b2 = init_simple_nn_params(kp, input_size, hidden_size,
                                           num_classes)

    # One-time hoisted parameter prep (bf16 cast + lane-dense padding).
    w1_b, b1_f, w2_p, b2_p, ncls = prepare_simple_nn_params(w1, b1, w2, b2)
    w1_b, b1_f, w2_p, b2_p = jax.block_until_ready((w1_b, b1_f, w2_p, b2_p))

    out = simple_nn_forward(x, w1_b, b1_f, w2_p, b2_p, num_classes=ncls)
    jax.block_until_ready(out)

    # Reference checks.
    ref_f32 = jnp.maximum(x @ w1 + b1, 0.0) @ w2 + b2            # pure f32 module
    xb = x.astype(jnp.bfloat16).astype(jnp.float32)
    w1bf = w1.astype(jnp.bfloat16).astype(jnp.float32)
    w2bf = w2.astype(jnp.bfloat16).astype(jnp.float32)
    hb = jnp.maximum(xb @ w1bf + b1, 0.0).astype(jnp.bfloat16).astype(jnp.float32)
    ref_bf16 = hb @ w2bf + b2                                     # emulates kernel dtypes

    assert out.shape == (batch, num_classes)
    assert jnp.allclose(out, ref_bf16, atol=1e-3, rtol=1e-3)      # tight vs bf16 ref
    assert jnp.allclose(out, ref_f32, atol=5e-2, rtol=5e-2)       # loose vs f32 module

    print("KERNEL_OK")
</pallas_src>

<mosaic_0001>
module attributes {stable_mosaic.version = 11 : i64} {
  func.func @_mlp_kernel(%arg0: i32, %arg1: memref<16x32xf32, #tpu.memory_space<vmem>>, %arg2: memref<32x64xbf16, #tpu.memory_space<vmem>>, %arg3: memref<1x64xf32, #tpu.memory_space<vmem>>, %arg4: memref<64x128xbf16, #tpu.memory_space<vmem>>, %arg5: memref<1x128xf32, #tpu.memory_space<vmem>>, %arg6: memref<16x128xf32, #tpu.memory_space<vmem>>) attributes {dimension_semantics = [#tpu.dimension_semantics<parallel>], iteration_bounds = array<i64: 1>, scalar_prefetch = 0 : i64, scratch_operands = 0 : i64, tpu.core_type = #tpu.core_type<tc>, window_params = [{transform_indices = @transform_0, window_bounds = array<i64: 16, 32>}, {pipeline_mode = #tpu.pipeline_mode<synchronous>, transform_indices = @transform_1, window_bounds = array<i64: 32, 64>}, {pipeline_mode = #tpu.pipeline_mode<synchronous>, transform_indices = @transform_2, window_bounds = array<i64: 1, 64>}, {pipeline_mode = #tpu.pipeline_mode<synchronous>, transform_indices = @transform_3, window_bounds = array<i64: 64, 128>}, {pipeline_mode = #tpu.pipeline_mode<synchronous>, transform_indices = @transform_4, window_bounds = array<i64: 1, 128>}, {transform_indices = @transform_5, window_bounds = array<i64: 16, 128>}]} {
    %c0 = arith.constant 0 : index
    %c0_0 = arith.constant 0 : index
    %0 = vector.load %arg1[%c0, %c0_0] : memref<16x32xf32, #tpu.memory_space<vmem>>, vector<16x32xf32>
    %1 = arith.truncf %0 : vector<16x32xf32> to vector<16x32xbf16>
    %c0_1 = arith.constant 0 : index
    %c0_2 = arith.constant 0 : index
    %2 = vector.load %arg2[%c0_1, %c0_2] : memref<32x64xbf16, #tpu.memory_space<vmem>>, vector<32x64xbf16>
    %cst = arith.constant dense<0.000000e+00> : vector<16x64xf32>
    %3 = tpu.matmul %1, %2, %cst {dimension_numbers = #tpu.dot_dimension_numbers<[1], [0], [0], [1], [0, 0, 1, 1], [], []>} : vector<16x32xbf16>, vector<32x64xbf16>, vector<16x64xf32> -> vector<16x64xf32>
    %c0_3 = arith.constant 0 : index
    %c0_4 = arith.constant 0 : index
    %4 = vector.load %arg3[%c0_3, %c0_4] : memref<1x64xf32, #tpu.memory_space<vmem>>, vector<1x64xf32>
    %5 = vector.broadcast %4 : vector<1x64xf32> to vector<16x64xf32>
    %6 = arith.addf %3, %5 : vector<16x64xf32>
    %cst_5 = arith.constant 0.000000e+00 : f32
    %7 = vector.broadcast %cst_5 : f32 to vector<16x64xf32>
    %8 = arith.maximumf %6, %7 : vector<16x64xf32>
    %9 = arith.truncf %8 : vector<16x64xf32> to vector<16x64xbf16>
    %c0_6 = arith.constant 0 : index
    %c0_7 = arith.constant 0 : index
    %10 = vector.load %arg4[%c0_6, %c0_7] : memref<64x128xbf16, #tpu.memory_space<vmem>>, vector<64x128xbf16>
    %cst_8 = arith.constant dense<0.000000e+00> : vector<16x128xf32>
    %11 = tpu.matmul %9, %10, %cst_8 {dimension_numbers = #tpu.dot_dimension_numbers<[1], [0], [0], [1], [0, 0, 1, 1], [], []>} : vector<16x64xbf16>, vector<64x128xbf16>, vector<16x128xf32> -> vector<16x128xf32>
    %c0_9 = arith.constant 0 : index
    %c0_10 = arith.constant 0 : index
    %12 = vector.load %arg5[%c0_9, %c0_10] : memref<1x128xf32, #tpu.memory_space<vmem>>, vector<1x128xf32>
    %13 = vector.broadcast %12 : vector<1x128xf32> to vector<16x128xf32>
    %14 = arith.addf %11, %13 : vector<16x128xf32>
    %c0_11 = arith.constant 0 : index
    %c0_12 = arith.constant 0 : index
    %15 = vector.load %arg6[%c0_11, %c0_12] : memref<16x128xf32, #tpu.memory_space<vmem>>, vector<16x128xf32>
    tpu.vector_store %arg6[%c0_11, %c0_12], %14 {strides = array<i32>} : memref<16x128xf32, #tpu.memory_space<vmem>>, vector<16x128xf32>,
    return
  }
  func.func @transform_0(%arg0: i32) -> (i32, i32) {
    %c0_i32 = arith.constant 0 : i32
    %c0_i32_0 = arith.constant 0 : i32
    return %arg0, %c0_i32 : i32, i32
  }
  func.func @transform_1(%arg0: i32) -> (i32, i32) {
    %c0_i32 = arith.constant 0 : i32
    %c0_i32_0 = arith.constant 0 : i32
    %c0_i32_1 = arith.constant 0 : i32
    return %c0_i32, %c0_i32_0 : i32, i32
  }
  func.func @transform_2(%arg0: i32) -> (i32, i32) {
    %c0_i32 = arith.constant 0 : i32
    %c0_i32_0 = arith.constant 0 : i32
    %c0_i32_1 = arith.constant 0 : i32
    return %c0_i32, %c0_i32_0 : i32, i32
  }
  func.func @transform_3(%arg0: i32) -> (i32, i32) {
    %c0_i32 = arith.constant 0 : i32
    %c0_i32_0 = arith.constant 0 : i32
    %c0_i32_1 = arith.constant 0 : i32
    return %c0_i32, %c0_i32_0 : i32, i32
  }
  func.func @transform_4(%arg0: i32) -> (i32, i32) {
    %c0_i32 = arith.constant 0 : i32
    %c0_i32_0 = arith.constant 0 : i32
    %c0_i32_1 = arith.constant 0 : i32
    return %c0_i32, %c0_i32_0 : i32, i32
  }
  func.func @transform_5(%arg0: i32) -> (i32, i32) {
    %c0_i32 = arith.constant 0 : i32
    %c0_i32_0 = arith.constant 0 : i32
    return %arg0, %c0_i32 : i32, i32
  }
}

</mosaic_0001>

<bundles_post_ra>
// kernel: simple_nn_forward.1
= control target key start
LH: loop header
LB: loop body
LE: loop exit
PB: predicated region body
PF: predicated region fallthrough
CT: control target
= control target key end

     0   :  { %10 = vsyncpa [#allocation3], 0  ;;  %s495_s0 = inlined_call_operand.hbm [shape: f32[16,32], index: 0, kind: input, shape index: {}]   ;;  %s496_s1 = inlined_call_operand.hbm [shape: bf16[32,64], index: 1, kind: input, shape index: {}]   ;;  %s497_s2 = inlined_call_operand.vmem [shape: f32[1,64], index: 2, kind: input, shape index: {}]   ;;  %s498_s3 = inlined_call_operand.hbm [shape: bf16[64,128], index: 3, kind: input, shape index: {}]   ;;  %s499_s4 = inlined_call_operand.vmem [shape: f32[1,128], index: 4, kind: input, shape index: {}]   ;;  %s500_s5 = inlined_call_operand.hbm [shape: f32[16,128], index: 5, kind: output, shape index: {}]  }
   0x1   :  { %11 = vsyncpa [#allocation6], 0 }
   0x2   :  { %12 = vsyncpa [#allocation4], 0  ;;  %s389_s18 = smov [#allocation5]   ;;  %s295_s22 = scalar_lea.hbm %s496_s1, 256 }
   0x3   :  { %s30_s19 = sshll.u32 %s389_s18, 4  ;;  %p296_p0 = scmp.ne.s32.totalorder %s496_s1, %s295_s22  ;;  %s31_s19 = int_to_ptr.vmem [resolvable:$true] %s30_s19 }
   0x4   :  { %p299_p1 = scmp.lt.u32.totalorder %s295_s22, %s496_s1 }
   0x6   :  { %p301_p2 = pnand %p299_p1, %p296_p0 }
   0x8   :  { %304 = shalt.err (!%p301_p2)
}
   0x9   :  { %s305_s27 = scalar_lea.vmem %s31_s19, 256  ;;  %p310_p4 = scmp.lt.s32.totalorder %s31_s19, %s31_s19 }
   0xa   :  { %p306_p3 = scmp.ne.s32.totalorder %s31_s19, %s305_s27  ;;  %p311_p5 = scmp.lt.s32.totalorder %s305_s27, %s305_s27 }
   0xc   :  { %p312_p6 = por %p311_p5, %p310_p4 }
   0xe   :  { %p313_p7 = pnand %p312_p6, %p306_p3 }
  0x10   :  { %316 = shalt.err (!%p313_p7)
}
  0x11   :  { %s390_s28 = smov 64   ;;  %s391_s29 = smov 4  }
  0x12   :  { %36 = dma.hbm_to_vmem [thread:$0]  %s496_s1, 256, %s31_s19, [#allocation6], %s390_s28, %s390_s28, %s391_s29  }
  0x13   :  { %s392_s7 = smov [#allocation2]   ;;  %s317_s11 = scalar_lea.hbm %s495_s0, 256 }
  0x14   :  { %s18_s8 = sshll.u32 %s392_s7, 4  ;;  %p318_p8 = scmp.ne.s32.totalorder %s495_s0, %s317_s11  ;;  %s19_s8 = int_to_ptr.vmem [resolvable:$true] %s18_s8 }
  0x15   :  { %p321_p9 = scmp.lt.u32.totalorder %s317_s11, %s495_s0 }
  0x17   :  { %p323_p10 = pnand %p321_p9, %p318_p8 }
  0x19   :  { %326 = shalt.err (!%p323_p10)
}
  0x1a   :  { %s327_s16 = scalar_lea.vmem %s19_s8, 256  ;;  %p332_p12 = scmp.lt.s32.totalorder %s19_s8, %s19_s8 }
  0x1b   :  { %p328_p11 = scmp.ne.s32.totalorder %s19_s8, %s327_s16  ;;  %p333_p13 = scmp.lt.s32.totalorder %s327_s16, %s327_s16 }
  0x1d   :  { %p334_p0 = por %p333_p13, %p332_p12 }
  0x1f   :  { %p335_p1 = pnand %p334_p0, %p328_p11 }
  0x21   :  { %338 = shalt.err (!%p335_p1)
}
  0x22   :  { %s393_s1 = smov 128   ;;  %s394_s17 = smov 8  }
  0x23   :  { %24 = dma.hbm_to_vmem [thread:$0]  %s495_s0, 256, %s19_s8, [#allocation3], %s393_s1, %s393_s1, %s394_s17  }
  0x24   :  { %s395_s20 = smov [#allocation7]   ;;  %s339_s24 = scalar_lea.hbm %s498_s3, 512 }
  0x25   :  { %s44_s21 = sshll.u32 %s395_s20, 4  ;;  %p340_p2 = scmp.ne.s32.totalorder %s498_s3, %s339_s24  ;;  %s45_s21 = int_to_ptr.vmem [resolvable:$true] %s44_s21 }
  0x26   :  { %p343_p3 = scmp.lt.u32.totalorder %s339_s24, %s498_s3 }
  0x28   :  { %p345_p4 = pnand %p343_p3, %p340_p2 }
  0x2a   :  { %348 = shalt.err (!%p345_p4)
}
  0x2b   :  { %s349_s6 = scalar_lea.vmem %s45_s21, 512  ;;  %p354_p6 = scmp.lt.s32.totalorder %s45_s21, %s45_s21 }
  0x2c   :  { %p350_p5 = scmp.ne.s32.totalorder %s45_s21, %s349_s6  ;;  %p355_p7 = scmp.lt.s32.totalorder %s349_s6, %s349_s6 }
  0x2e   :  { %p356_p8 = por %p355_p7, %p354_p6 }
  0x30   :  { %p357_p9 = pnand %p356_p8, %p350_p5 }
  0x32   :  { %360 = shalt.err (!%p357_p9)
}
  0x33   :  { %50 = dma.hbm_to_vmem [thread:$0]  %s498_s3, 512, %s45_s21, [#allocation6], %s390_s28, %s390_s28, %s391_s29  }
  0x34   :  { %383 = dma.done.wait [#allocation3], 256  }
  0x35   :  { %384 = vsyncadd [#allocation3], 4294967040 }
  0x36   :  { %385 = dma.done.wait [#allocation6], 768  }
  0x37   :  { %386 = vsyncadd [#allocation6], 4294966528  ;;  %v396_v0 = vmov 0.0   ;;  %vm397_vm0 = vmmov 0   ;;  %v289_v1 = vld [vmem:[#allocation5] sm:$0xff]   ;;  %v290_v2 = vld [vmem:[#allocation5 + $0x8] sm:$0xff]  }
  0x38   :  { %259 = vmatprep.subr.bf16.mxu0 %v396_v0  ;;  %263 = vmatprep.mubr.msk.bf16.mxu0 %vm397_vm0, %v396_v0  ;;  %v63_v3 = vld [vmem:[#allocation2] sm:$0xff]  ;;  %v64_v4 = vld [vmem:[#allocation2 + $0x8] sm:$0xff]  ;;  %vm89_vm1 = vcmask 261120   ;;  %v293_v8 = vld [vmem:[#allocation7 + $0x10] sm:$0xff]   ;;  %vm176_vm2 = vcmask 523264   ;;  %s398_s9 = smov [#allocation8]  }
  0x39   :  { %267 = vmatprep.subr.bf16.mxu1 %v396_v0  ;;  %275 = vmatprep.mubr.msk.bf16.mxu1 %vm397_vm0, %v396_v0  ;;  %v291_v5 = vld [vmem:[#allocation7] sm:$0xff]   ;;  %v292_v6 = vld [vmem:[#allocation7 + $0x8] sm:$0xff]   ;;  %v65_v7 = vpack.c.bf16 %v64_v4, %v63_v3  ;;  %v294_v9 = vld [vmem:[#allocation7 + $0x18] sm:$0xff]   ;;  %s228_s10 = sshll.u32 %s398_s9, 4  ;;  %s229_s10 = int_to_ptr.vmem [resolvable:$true] %s228_s10 }
  0x3a   :  { %260 = vmatpush3.bf16.msra.mxu0 %v289_v1  ;;  %268 = vmatpush3.bf16.msra.mxu1 %v291_v5  ;;  %v241_v10 = vld [vmem:[%s497_s2] ss:$0 sm:$0xff]  ;;  %s361_s2 = scalar_lea.vmem %s229_s10, 256  ;;  %p366_p11 = scmp.lt.s32.totalorder %s229_s10, %s229_s10 }
  0x3b   :  { %261 = vmatprep.subr.bf16.mxu0 %v396_v0  ;;  %269 = vmatprep.subr.bf16.mxu1 %v396_v0  ;;  %v245_v20 = vld [vmem:[%s499_s4] ss:$0 sm:$0xff]  ;;  %p362_p10 = scmp.ne.s32.totalorder %s229_s10, %s361_s2  ;;  %p367_p12 = scmp.lt.s32.totalorder %s361_s2, %s361_s2 }
  0x3d   :  { %p368_p13 = por %p367_p12, %p366_p11 }
  0x3e   :  { %262 = vmatpush3.bf16.msra.mxu0 %v290_v2  ;;  %270 = vmatpush3.bf16.msra.mxu1 %v292_v6 }
  0x3f   :  { %271 = vmatprep.subr.bf16.mxu1 %v396_v0  ;;  %p369_p0 = pnand %p368_p13, %p362_p10 }
  0x41   :  { %264 = vmatmul.mubr.msk.bf16.vlgmr.msra.gmra.mrb[0].mxu0 %vm89_vm1, %v65_v7 }
  0x42   :  { %272 = vmatpush3.bf16.msra.mxu1 %v293_v8 }
  0x43   :  { %273 = vmatprep.subr.bf16.mxu1 %v396_v0 }
  0x46   :  { %274 = vmatpush3.bf16.msra.mxu1 %v294_v9 }
 0x114   :  { %v127_v11 = vpop.f32.mrb[0].mxu0 }
 0x115   :  { %v128_v12 = vadd.f32 %v241_v10, %v127_v11  ;;  %v265_v13 = vpop.f32.mrb[1].mxu0 }
 0x116   :  { %v130_v14 = vpop.f32.mrb[2].mxu0 }
 0x117   :  { %v131_v15 = vadd.f32 %v241_v10, %v130_v14  ;;  %v266_v16 = vpop.f32.mrb[3].mxu0  ;;  %v134_v17 = vmax.f32 %v128_v12, 0.0 }
 0x119   :  { %v135_v18 = vmax.f32 %v131_v15, 0.0 }
 0x11b   :  { %v136_v19 = vpack.c.bf16 %v135_v18, %v134_v17 }
 0x11d   :  { %276 = vmatmul.mubr.msk.bf16.vlgmr.msra.gmra.mrb[0].mxu1 %vm176_vm2, %v136_v19 }
 0x1f0   :  { %v214_v21 = vpop.f32.mrb[0].mxu1 }
 0x1f1   :  { %v215_v22 = vadd.f32 %v245_v20, %v214_v21  ;;  %v277_v23 = vpop.f32.mrb[1].mxu1 }
 0x1f2   :  { %v217_v24 = vpop.f32.mrb[2].mxu1 }
 0x1f3   :  { %221 = vst [vmem:[#allocation8] sm:$0xff] %v215_v22  ;;  %v218_v25 = vadd.f32 %v245_v20, %v217_v24  ;;  %v278_v26 = vpop.f32.mrb[3].mxu1 }
 0x1f5   :  { %222 = vst [vmem:[#allocation8 + $0x8] sm:$0xff] %v218_v25 }
 0x1f6   :  { %372 = shalt.err (!%p369_p0)
}
 0x1f7   :  { %s373_s12 = scalar_lea.hbm %s500_s5, 256 }
 0x1f8   :  { %p374_p1 = scmp.ne.s32.totalorder %s500_s5, %s373_s12  ;;  %p377_p2 = scmp.lt.u32.totalorder %s373_s12, %s500_s5 }
 0x1fa   :  { %p379_p3 = pnand %p377_p2, %p374_p1 }
 0x1fc   :  { %382 = shalt.err (!%p379_p3)
}
 0x1fd   :  { %234 = dma.vmem_to_hbm [thread:$0]  %s229_s10, 256, %s500_s5, [#allocation4], %s393_s1, %s393_s1, %s394_s17  }
 0x1fe   :  { %387 = dma.done.wait [#allocation4], 256  }
 0x1ff   :  { %388 = vsyncadd [#allocation4], 4294967040 }
 0x200   :  { %238 = vsyncpa [#allocation3], 1 }
 0x201   :  { %239 = vsyncpa [#allocation6], 1 }
 0x202   :  { %240 = vsyncpa [#allocation4], 1 }

</bundles_post_ra>
